<compile_context>
chip_gen: v7x
topology: tpu7x:2x2x1
jax: 0.10.0
libtpu: 0.0.40
codegen_flags: <defaults>
</compile_context>

<pallas_src>
import math
from functools import partial

import jax
import jax.numpy as jnp
from jax.experimental import pallas as pl
from jax.experimental.pallas import tpu as pltpu


# --------------------------------------------------------------------------- #
# Small helpers
# --------------------------------------------------------------------------- #
def _padded_bytes(shape, itemsize):
    """VMEM footprint of one block, accounting for (8, 128) sublane/lane padding."""
    if not shape:
        return itemsize
    s = [int(d) for d in shape]
    s[-1] = (s[-1] + 127) // 128 * 128
    if len(s) >= 2:
        s[-2] = (s[-2] + 7) // 8 * 8
    n = 1
    for d in s:
        n *= d
    return n * itemsize


def _vmem_limit(est_bytes):
    """Scoped-VMEM limit: only raise above the compiler default when needed,
    and keep headroom below the physical per-core VMEM (generation-aware)."""
    want = int(est_bytes * 1.3)
    if want <= 12 * 1024 * 1024:
        return None                           # compiler default is plenty
    try:
        cap = int(pltpu.get_tpu_info().vmem_capacity_bytes)
    except Exception:                         # pragma: no cover
        cap = 64 * 1024 * 1024                # be conservative (v7x per-TC VMEM)
    return int(min(max(want, 32 * 1024 * 1024), int(cap * 0.85)))


_SINGLE_BUFFER_MIN_BYTES = 1 << 20


def _needs_single_buffer(nbytes):
    return nbytes >= _SINGLE_BUFFER_MIN_BYTES and hasattr(pl, "Buffered")


def _const_spec(block_shape, index_map, nbytes):
    """BlockSpec for a block whose index never changes (weights / biases).
    Single-buffer it when big enough to matter: the second pipeline buffer is
    pure VMEM waste for constant blocks (largest payoff on v7x's 64 MiB/TC)."""
    if _needs_single_buffer(nbytes):
        try:
            return pl.BlockSpec(block_shape, index_map,
                                pipeline_mode=pl.Buffered(1))
        except Exception:  # pragma: no cover - jax without pipeline_mode support
            pass
    return pl.BlockSpec(block_shape, index_map)


# --------------------------------------------------------------------------- #
# Kernel 1: fused QKV projection + head-major repack
# --------------------------------------------------------------------------- #
def _qkv_proj_kernel(x_ref, w_ref, b_ref, q_ref, k_ref, v_ref, *, scale):
    """One (batch, seq-tile) step: qkv = x @ W_attn + b, split per head."""
    x = x_ref[0].astype(w_ref.dtype)                               # (Tr, C)
    qkv = jnp.dot(x, w_ref[...], preferred_element_type=jnp.float32)
    qkv = qkv + b_ref[...]                                         # (Tr, 3C) f32

    _, n_head, _, hd = q_ref.shape
    C = n_head * hd
    # Repack each head once, outside the attention inner loop; fold 1/sqrt(hd)
    # into q here (cheapest place).
    # TODO(synk): for hd < 128 these per-head stores are lane-masked; if the vst
    # slot ever binds, switch to a head-blocked (Tr, C) output layout instead.
    for h in range(n_head):
        lo = h * hd
        q_ref[0, h] = (qkv[:, lo:lo + hd] * scale).astype(q_ref.dtype)
        k_ref[0, h] = qkv[:, C + lo:C + lo + hd].astype(k_ref.dtype)
        v_ref[0, h] = qkv[:, 2 * C + lo:2 * C + lo + hd].astype(v_ref.dtype)


# --------------------------------------------------------------------------- #
# Kernel 2: flash attention over whole-sequence-resident K/V + fused out-proj
# --------------------------------------------------------------------------- #
def _flash_attn_kernel(q_ref, k_ref, v_ref, wp_ref, bp_ref, o_ref,
                       m_ref, l_ref, acc_ref, *, block_q, block_k, approx_recip):
    qi = pl.program_id(1)
    n_head, _, hd = acc_ref.shape

    # Every grid step handles one complete q-tile (init + KV loop + finalize),
    # so steps are independent and both grid axes are 'parallel'.
    m_ref[...] = jnp.full(m_ref.shape, -jnp.inf, dtype=m_ref.dtype)
    l_ref[...] = jnp.zeros(l_ref.shape, dtype=l_ref.dtype)
    acc_ref[...] = jnp.zeros(acc_ref.shape, dtype=acc_ref.dtype)

    q = q_ref[0]                                                   # (H, bq, hd)

    def attend(kc, masked):
        start = pl.multiple_of(kc * block_k, block_k)
        k = k_ref[0, :, pl.ds(start, block_k), :]                  # (H, bk, hd)
        v = v_ref[0, :, pl.ds(start, block_k), :]                  # (H, bk, hd)
        # Heads batched; contraction on hd directly (no explicit k.T transpose).
        s = jnp.einsum('hqd,hkd->hqk', q, k,
                       preferred_element_type=jnp.float32)         # (H, bq, bk)
        if masked:  # only chunks that touch the diagonal pay for the mask
            q_pos = qi * block_q + jax.lax.broadcasted_iota(
                jnp.int32, (block_q, block_k), 0)
            k_pos = start + jax.lax.broadcasted_iota(
                jnp.int32, (block_q, block_k), 1)
            s = jnp.where((k_pos <= q_pos)[None], s, -jnp.inf)
        m_prev = m_ref[...]                                        # (H, bq, 1)
        m_new = jnp.maximum(m_prev, s.max(axis=-1, keepdims=True))
        alpha = jnp.exp(m_prev - m_new)
        # TODO(synk): if the EUP slot proves binding on v6e/v7x, compute p in bf16.
        p = jnp.exp(s - m_new)                                     # f32
        l_ref[...] = alpha * l_ref[...] + p.sum(axis=-1, keepdims=True)
        acc_ref[...] = alpha * acc_ref[...] + jnp.einsum(
            'hqk,hkd->hqd', p.astype(v.dtype), v,
            preferred_element_type=jnp.float32)
        m_ref[...] = m_new

    # Causal bounds: chunks fully below the q-tile need no mask; chunks past the
    # q-tile's last row are never visited (no dead work above the diagonal).
    n_full = (qi * block_q) // block_k
    n_total = ((qi + 1) * block_q + block_k - 1) // block_k

    def _full_body(kc, carry):
        attend(kc, masked=False)
        return carry

    def _diag_body(kc, carry):
        attend(kc, masked=True)
        return carry

    jax.lax.fori_loop(0, n_full, _full_body, 0)
    jax.lax.fori_loop(n_full, n_total, _diag_body, 0)

    # Finalize: normalize and fuse the output projection as ONE depth-C matmul.
    # (approx reciprocal only on the bf16 fast path.)
    inv_l = pl.reciprocal(l_ref[...], approx=approx_recip)         # (H, bq, 1)
    y2d = jnp.concatenate(
        [acc_ref[h] * inv_l[h] for h in range(n_head)], axis=-1)   # (bq, C) f32
    out = jnp.dot(y2d.astype(wp_ref.dtype), wp_ref[...],
                  preferred_element_type=jnp.float32)
    o_ref[0] = (out + bp_ref[...]).astype(o_ref.dtype)             # lane-dense (bq, C)


# --------------------------------------------------------------------------- #
# Wrapper
# --------------------------------------------------------------------------- #
def causal_self_attention(x, w_attn, b_attn, w_proj, b_proj, n_head,
                          *, compute_dtype=jnp.bfloat16,
                          block_q=256, block_k=256, qkv_tile=256):
    """x: (B, T, C); w_attn: (C, 3C); b_attn: (3C,); w_proj: (C, C); b_proj: (C,)."""
    B, T, C = x.shape
    assert C % n_head == 0
    hd = C // n_head
    block_q = min(block_q, T)
    block_k = min(block_k, T)
    qkv_tile = min(qkv_tile, T)
    # TODO(synk): no ragged/partial-tile path; T must tile evenly (fixed block_size).
    assert T % block_q == 0 and T % block_k == 0 and T % qkv_tile == 0
    nq = T // block_q
    nt = T // qkv_tile
    scale = 1.0 / math.sqrt(hd)
    approx_recip = jnp.dtype(compute_dtype) == jnp.dtype(jnp.bfloat16)

    # Cast weights once outside the kernels; biases stay f32 (added after the
    # f32-accumulated matmuls).
    w_attn_c = w_attn.astype(compute_dtype)
    w_proj_c = w_proj.astype(compute_dtype)
    b_attn2 = b_attn.reshape(1, 3 * C).astype(jnp.float32)
    b_proj2 = b_proj.reshape(1, C).astype(jnp.float32)

    cd = jnp.dtype(compute_dtype).itemsize
    xd = jnp.dtype(x.dtype).itemsize

    # ---- Kernel 1: fused QKV projection, head-major q/k/v --------------------
    # TODO(synk): for C >= ~1536 on v7x (64 MiB/TC VMEM), additionally tile W_attn
    # over the 3C output dimension instead of keeping it whole in VMEM.
    w_attn_bytes = _padded_bytes((C, 3 * C), cd)
    b_attn_bytes = _padded_bytes((1, 3 * C), 4)
    qkv_vmem = (2 * _padded_bytes((qkv_tile, C), xd)
                + (1 if _needs_single_buffer(w_attn_bytes) else 2) * w_attn_bytes
                + (1 if _needs_single_buffer(b_attn_bytes) else 2) * b_attn_bytes
                + 3 * 2 * n_head * _padded_bytes((qkv_tile, hd), cd))
    q, k, v = pl.pallas_call(
        partial(_qkv_proj_kernel, scale=scale),
        out_shape=tuple(jax.ShapeDtypeStruct((B, n_head, T, hd), compute_dtype)
                        for _ in range(3)),
        grid_spec=pltpu.PrefetchScalarGridSpec(
            num_scalar_prefetch=0,
            grid=(B, nt),
            in_specs=[
                pl.BlockSpec((1, qkv_tile, C), lambda b, t: (b, t, 0)),
                _const_spec((C, 3 * C), lambda b, t: (0, 0), w_attn_bytes),
                _const_spec((1, 3 * C), lambda b, t: (0, 0), b_attn_bytes),
            ],
            out_specs=[pl.BlockSpec((1, n_head, qkv_tile, hd),
                                    lambda b, t: (b, 0, t, 0))] * 3,
        ),
        compiler_params=pltpu.CompilerParams(
            dimension_semantics=("parallel", "parallel"),
            vmem_limit_bytes=_vmem_limit(qkv_vmem)),
    )(x, w_attn_c, b_attn2)

    # ---- Kernel 2: flash attention + fused output projection -----------------
    # K/V block index is constant in the q-tile axis, so each batch's K/V is
    # DMA'd into VMEM once and reused by every q-tile (raising arithmetic
    # intensity ~nq-fold vs. streaming a K-tile per (qi, ki) step).
    # TODO(synk): for very long T on v7x (64 MiB/TC), whole-T K/V residency stops
    # fitting around T ~ 4K; fall back to a chunked-K/V grid axis there.
    w_proj_bytes = _padded_bytes((C, C), cd)
    b_proj_bytes = _padded_bytes((1, C), 4)
    attn_vmem = (2 * n_head * _padded_bytes((block_q, hd), cd)           # q
                 + 2 * 2 * n_head * _padded_bytes((T, hd), cd)           # k, v
                 + (1 if _needs_single_buffer(w_proj_bytes) else 2) * w_proj_bytes
                 + (1 if _needs_single_buffer(b_proj_bytes) else 2) * b_proj_bytes
                 + 2 * _padded_bytes((block_q, C), xd)                   # out
                 + 2 * n_head * _padded_bytes((block_q, 1), 4)           # m, l
                 + n_head * _padded_bytes((block_q, hd), 4))             # acc
    out = pl.pallas_call(
        partial(_flash_attn_kernel, block_q=block_q, block_k=block_k,
                approx_recip=approx_recip),
        out_shape=jax.ShapeDtypeStruct((B, T, C), x.dtype),
        grid_spec=pltpu.PrefetchScalarGridSpec(
            num_scalar_prefetch=0,
            grid=(B, nq),
            in_specs=[
                pl.BlockSpec((1, n_head, block_q, hd),
                             lambda b, qi: (b, 0, qi, 0)),                # q tile
                pl.BlockSpec((1, n_head, T, hd),
                             lambda b, qi: (b, 0, 0, 0)),                 # K (whole T)
                pl.BlockSpec((1, n_head, T, hd),
                             lambda b, qi: (b, 0, 0, 0)),                 # V (whole T)
                _const_spec((C, C), lambda b, qi: (0, 0), w_proj_bytes),  # W_proj
                _const_spec((1, C), lambda b, qi: (0, 0), b_proj_bytes),  # b_proj
            ],
            out_specs=pl.BlockSpec((1, block_q, C), lambda b, qi: (b, qi, 0)),
            scratch_shapes=[
                pltpu.VMEM((n_head, block_q, 1), jnp.float32),    # running max m
                pltpu.VMEM((n_head, block_q, 1), jnp.float32),    # running denom l
                pltpu.VMEM((n_head, block_q, hd), jnp.float32),   # output accumulator
            ],
        ),
        compiler_params=pltpu.CompilerParams(
            dimension_semantics=("parallel", "parallel"),
            vmem_limit_bytes=_vmem_limit(attn_vmem)),
    )(q, k, v, w_proj_c, b_proj2)
    return out


# --------------------------------------------------------------------------- #
# Pure-JAX reference + self-check
# --------------------------------------------------------------------------- #
def _reference(x, w_attn, b_attn, w_proj, b_proj, n_head):
    B, T, C = x.shape
    hd = C // n_head
    with jax.default_matmul_precision("highest"):
        qkv = x @ w_attn + b_attn
        q, k, v = jnp.split(qkv, 3, axis=-1)
        q = q.reshape(B, T, n_head, hd).transpose(0, 2, 1, 3)
        k = k.reshape(B, T, n_head, hd).transpose(0, 2, 1, 3)
        v = v.reshape(B, T, n_head, hd).transpose(0, 2, 1, 3)
        attn = (q @ jnp.swapaxes(k, -2, -1)) * (hd ** -0.5)
        mask = jnp.tril(jnp.ones((T, T), dtype=bool))
        attn = jnp.where(mask[None, None], attn, -jnp.inf)
        attn = jax.nn.softmax(attn, axis=-1)
        y = (attn @ v).transpose(0, 2, 1, 3).reshape(B, T, C)
        return y @ w_proj + b_proj


if __name__ == "__main__":
    # Small config consistent with the module (block_size >= T).
    B, T, C, n_head = 2, 8, 32, 4

    key = jax.random.PRNGKey(0)
    kx, kwa, kba, kwp, kbp = jax.random.split(key, 5)

    x = jax.random.normal(kx, (B, T, C), dtype=jnp.float32)
    w_attn = jax.random.normal(kwa, (C, 3 * C), dtype=jnp.float32) * (1.0 / math.sqrt(C))
    b_attn = jax.random.normal(kba, (3 * C,), dtype=jnp.float32) * 0.01
    w_proj = jax.random.normal(kwp, (C, C), dtype=jnp.float32) * (1.0 / math.sqrt(C))
    b_proj = jax.random.normal(kbp, (C,), dtype=jnp.float32) * 0.01

    ref = _reference(x, w_attn, b_attn, w_proj, b_proj, n_head)

    # Exact-semantics check: f32 MXU path, tight tolerance.
    out_f32 = causal_self_attention(x, w_attn, b_attn, w_proj, b_proj, n_head,
                                    compute_dtype=jnp.float32)
    out_f32 = jax.block_until_ready(out_f32)
    assert out_f32.shape == (B, T, C)
    assert jnp.allclose(out_f32, ref, atol=1e-4, rtol=1e-4), "f32 path mismatch vs reference"

    # Production fast path: bf16 MXU inputs, f32 accumulation / f32 softmax stats.
    out_bf16 = causal_self_attention(x, w_attn, b_attn, w_proj, b_proj, n_head,
                                     compute_dtype=jnp.bfloat16)
    out_bf16 = jax.block_until_ready(out_bf16)
    err = jnp.abs(out_bf16 - ref)
    assert float(jnp.max(err)) < 0.3 and float(jnp.mean(err)) < 0.05, \
        "bf16 path drifted too far from f32 reference"

    print("KERNEL_OK")
</pallas_src>

<mosaic_0001>
module attributes {stable_mosaic.version = 11 : i64} {
  func.func @_qkv_proj_kernel(%arg0: i32, %arg1: i32, %arg2: memref<1x8x32xf32, #tpu.memory_space<vmem>>, %arg3: memref<32x96xf32, #tpu.memory_space<vmem>>, %arg4: memref<1x96xf32, #tpu.memory_space<vmem>>, %arg5: memref<1x4x8x8xf32, #tpu.memory_space<vmem>>, %arg6: memref<1x4x8x8xf32, #tpu.memory_space<vmem>>, %arg7: memref<1x4x8x8xf32, #tpu.memory_space<vmem>>) attributes {dimension_semantics = [#tpu.dimension_semantics<parallel>, #tpu.dimension_semantics<parallel>], iteration_bounds = array<i64: 2, 1>, scalar_prefetch = 0 : i64, scratch_operands = 0 : i64, tpu.core_type = #tpu.core_type<tc>, window_params = [{transform_indices = @transform_0, window_bounds = array<i64: 1, 8, 32>}, {pipeline_mode = #tpu.pipeline_mode<synchronous>, transform_indices = @transform_1, window_bounds = array<i64: 32, 96>}, {pipeline_mode = #tpu.pipeline_mode<synchronous>, transform_indices = @transform_2, window_bounds = array<i64: 1, 96>}, {transform_indices = @transform_3, window_bounds = array<i64: 1, 4, 8, 8>}, {transform_indices = @transform_4, window_bounds = array<i64: 1, 4, 8, 8>}, {transform_indices = @transform_5, window_bounds = array<i64: 1, 4, 8, 8>}]} {
    %c0 = arith.constant 0 : index
    %c0_0 = arith.constant 0 : index
    %c0_1 = arith.constant 0 : index
    %0 = vector.load %arg2[%c0, %c0_0, %c0_1] : memref<1x8x32xf32, #tpu.memory_space<vmem>>, vector<1x8x32xf32>
    %1 = vector.shape_cast %0 : vector<1x8x32xf32> to vector<8x32xf32>
    %c0_2 = arith.constant 0 : index
    %c0_3 = arith.constant 0 : index
    %2 = vector.load %arg3[%c0_2, %c0_3] : memref<32x96xf32, #tpu.memory_space<vmem>>, vector<32x96xf32>
    %cst = arith.constant dense<0.000000e+00> : vector<8x96xf32>
    %3 = tpu.matmul %1, %2, %cst {dimension_numbers = #tpu.dot_dimension_numbers<[1], [0], [0], [1], [0, 0, 1, 1], [], []>} : vector<8x32xf32>, vector<32x96xf32>, vector<8x96xf32> -> vector<8x96xf32>
    %c0_4 = arith.constant 0 : index
    %c0_5 = arith.constant 0 : index
    %4 = vector.load %arg4[%c0_4, %c0_5] : memref<1x96xf32, #tpu.memory_space<vmem>>, vector<1x96xf32>
    %5 = vector.broadcast %4 : vector<1x96xf32> to vector<8x96xf32>
    %6 = arith.addf %3, %5 : vector<8x96xf32>
    %7 = vector.extract_strided_slice %6 {offsets = [0, 0], sizes = [8, 8], strides = [1, 1]} : vector<8x96xf32> to vector<8x8xf32>
    %cst_6 = arith.constant 0.353553385 : f32
    %8 = vector.broadcast %cst_6 : f32 to vector<8x8xf32>
    %9 = arith.mulf %7, %8 : vector<8x8xf32>
    %c0_7 = arith.constant 0 : index
    %c0_8 = arith.constant 0 : index
    %c0_9 = arith.constant 0 : index
    %c0_10 = arith.constant 0 : index
    %10 = vector.load %arg5[%c0_7, %c0_8, %c0_9, %c0_10] : memref<1x4x8x8xf32, #tpu.memory_space<vmem>>, vector<1x1x8x8xf32>
    %11 = vector.shape_cast %10 : vector<1x1x8x8xf32> to vector<8x8xf32>
    %12 = vector.shape_cast %9 : vector<8x8xf32> to vector<1x1x8x8xf32>
    tpu.vector_store %arg5[%c0_7, %c0_8, %c0_9, %c0_10], %12 {strides = array<i32>} : memref<1x4x8x8xf32, #tpu.memory_space<vmem>>, vector<1x1x8x8xf32>,
    %13 = vector.extract_strided_slice %6 {offsets = [0, 32], sizes = [8, 8], strides = [1, 1]} : vector<8x96xf32> to vector<8x8xf32>
    %c0_11 = arith.constant 0 : index
    %c0_12 = arith.constant 0 : index
    %c0_13 = arith.constant 0 : index
    %c0_14 = arith.constant 0 : index
    %14 = vector.load %arg6[%c0_11, %c0_12, %c0_13, %c0_14] : memref<1x4x8x8xf32, #tpu.memory_space<vmem>>, vector<1x1x8x8xf32>
    %15 = vector.shape_cast %14 : vector<1x1x8x8xf32> to vector<8x8xf32>
    %16 = vector.shape_cast %13 : vector<8x8xf32> to vector<1x1x8x8xf32>
    tpu.vector_store %arg6[%c0_11, %c0_12, %c0_13, %c0_14], %16 {strides = array<i32>} : memref<1x4x8x8xf32, #tpu.memory_space<vmem>>, vector<1x1x8x8xf32>,
    %17 = vector.extract_strided_slice %6 {offsets = [0, 64], sizes = [8, 8], strides = [1, 1]} : vector<8x96xf32> to vector<8x8xf32>
    %c0_15 = arith.constant 0 : index
    %c0_16 = arith.constant 0 : index
    %c0_17 = arith.constant 0 : index
    %c0_18 = arith.constant 0 : index
    %18 = vector.load %arg7[%c0_15, %c0_16, %c0_17, %c0_18] : memref<1x4x8x8xf32, #tpu.memory_space<vmem>>, vector<1x1x8x8xf32>
    %19 = vector.shape_cast %18 : vector<1x1x8x8xf32> to vector<8x8xf32>
    %20 = vector.shape_cast %17 : vector<8x8xf32> to vector<1x1x8x8xf32>
    tpu.vector_store %arg7[%c0_15, %c0_16, %c0_17, %c0_18], %20 {strides = array<i32>} : memref<1x4x8x8xf32, #tpu.memory_space<vmem>>, vector<1x1x8x8xf32>,
    %21 = vector.extract_strided_slice %6 {offsets = [0, 8], sizes = [8, 8], strides = [1, 1]} : vector<8x96xf32> to vector<8x8xf32>
    %cst_19 = arith.constant 0.353553385 : f32
    %22 = vector.broadcast %cst_19 : f32 to vector<8x8xf32>
    %23 = arith.mulf %21, %22 : vector<8x8xf32>
    %c0_20 = arith.constant 0 : index
    %c1 = arith.constant 1 : index
    %c0_21 = arith.constant 0 : index
    %c0_22 = arith.constant 0 : index
    %24 = vector.load %arg5[%c0_20, %c1, %c0_21, %c0_22] : memref<1x4x8x8xf32, #tpu.memory_space<vmem>>, vector<1x1x8x8xf32>
    %25 = vector.shape_cast %24 : vector<1x1x8x8xf32> to vector<8x8xf32>
    %26 = vector.shape_cast %23 : vector<8x8xf32> to vector<1x1x8x8xf32>
    tpu.vector_store %arg5[%c0_20, %c1, %c0_21, %c0_22], %26 {strides = array<i32>} : memref<1x4x8x8xf32, #tpu.memory_space<vmem>>, vector<1x1x8x8xf32>,
    %27 = vector.extract_strided_slice %6 {offsets = [0, 40], sizes = [8, 8], strides = [1, 1]} : vector<8x96xf32> to vector<8x8xf32>
    %c0_23 = arith.constant 0 : index
    %c1_24 = arith.constant 1 : index
    %c0_25 = arith.constant 0 : index
    %c0_26 = arith.constant 0 : index
    %28 = vector.load %arg6[%c0_23, %c1_24, %c0_25, %c0_26] : memref<1x4x8x8xf32, #tpu.memory_space<vmem>>, vector<1x1x8x8xf32>
    %29 = vector.shape_cast %28 : vector<1x1x8x8xf32> to vector<8x8xf32>
    %30 = vector.shape_cast %27 : vector<8x8xf32> to vector<1x1x8x8xf32>
    tpu.vector_store %arg6[%c0_23, %c1_24, %c0_25, %c0_26], %30 {strides = array<i32>} : memref<1x4x8x8xf32, #tpu.memory_space<vmem>>, vector<1x1x8x8xf32>,
    %31 = vector.extract_strided_slice %6 {offsets = [0, 72], sizes = [8, 8], strides = [1, 1]} : vector<8x96xf32> to vector<8x8xf32>
    %c0_27 = arith.constant 0 : index
    %c1_28 = arith.constant 1 : index
    %c0_29 = arith.constant 0 : index
    %c0_30 = arith.constant 0 : index
    %32 = vector.load %arg7[%c0_27, %c1_28, %c0_29, %c0_30] : memref<1x4x8x8xf32, #tpu.memory_space<vmem>>, vector<1x1x8x8xf32>
    %33 = vector.shape_cast %32 : vector<1x1x8x8xf32> to vector<8x8xf32>
    %34 = vector.shape_cast %31 : vector<8x8xf32> to vector<1x1x8x8xf32>
    tpu.vector_store %arg7[%c0_27, %c1_28, %c0_29, %c0_30], %34 {strides = array<i32>} : memref<1x4x8x8xf32, #tpu.memory_space<vmem>>, vector<1x1x8x8xf32>,
    %35 = vector.extract_strided_slice %6 {offsets = [0, 16], sizes = [8, 8], strides = [1, 1]} : vector<8x96xf32> to vector<8x8xf32>
    %cst_31 = arith.constant 0.353553385 : f32
    %36 = vector.broadcast %cst_31 : f32 to vector<8x8xf32>
    %37 = arith.mulf %35, %36 : vector<8x8xf32>
    %c0_32 = arith.constant 0 : index
    %c2 = arith.constant 2 : index
    %c0_33 = arith.constant 0 : index
    %c0_34 = arith.constant 0 : index
    %38 = vector.load %arg5[%c0_32, %c2, %c0_33, %c0_34] : memref<1x4x8x8xf32, #tpu.memory_space<vmem>>, vector<1x1x8x8xf32>
    %39 = vector.shape_cast %38 : vector<1x1x8x8xf32> to vector<8x8xf32>
    %40 = vector.shape_cast %37 : vector<8x8xf32> to vector<1x1x8x8xf32>
    tpu.vector_store %arg5[%c0_32, %c2, %c0_33, %c0_34], %40 {strides = array<i32>} : memref<1x4x8x8xf32, #tpu.memory_space<vmem>>, vector<1x1x8x8xf32>,
    %41 = vector.extract_strided_slice %6 {offsets = [0, 48], sizes = [8, 8], strides = [1, 1]} : vector<8x96xf32> to vector<8x8xf32>
    %c0_35 = arith.constant 0 : index
    %c2_36 = arith.constant 2 : index
    %c0_37 = arith.constant 0 : index
    %c0_38 = arith.constant 0 : index
    %42 = vector.load %arg6[%c0_35, %c2_36, %c0_37, %c0_38] : memref<1x4x8x8xf32, #tpu.memory_space<vmem>>, vector<1x1x8x8xf32>
    %43 = vector.shape_cast %42 : vector<1x1x8x8xf32> to vector<8x8xf32>
    %44 = vector.shape_cast %41 : vector<8x8xf32> to vector<1x1x8x8xf32>
    tpu.vector_store %arg6[%c0_35, %c2_36, %c0_37, %c0_38], %44 {strides = array<i32>} : memref<1x4x8x8xf32, #tpu.memory_space<vmem>>, vector<1x1x8x8xf32>,
    %45 = vector.extract_strided_slice %6 {offsets = [0, 80], sizes = [8, 8], strides = [1, 1]} : vector<8x96xf32> to vector<8x8xf32>
    %c0_39 = arith.constant 0 : index
    %c2_40 = arith.constant 2 : index
    %c0_41 = arith.constant 0 : index
    %c0_42 = arith.constant 0 : index
    %46 = vector.load %arg7[%c0_39, %c2_40, %c0_41, %c0_42] : memref<1x4x8x8xf32, #tpu.memory_space<vmem>>, vector<1x1x8x8xf32>
    %47 = vector.shape_cast %46 : vector<1x1x8x8xf32> to vector<8x8xf32>
    %48 = vector.shape_cast %45 : vector<8x8xf32> to vector<1x1x8x8xf32>
    tpu.vector_store %arg7[%c0_39, %c2_40, %c0_41, %c0_42], %48 {strides = array<i32>} : memref<1x4x8x8xf32, #tpu.memory_space<vmem>>, vector<1x1x8x8xf32>,
    %49 = vector.extract_strided_slice %6 {offsets = [0, 24], sizes = [8, 8], strides = [1, 1]} : vector<8x96xf32> to vector<8x8xf32>
    %cst_43 = arith.constant 0.353553385 : f32
    %50 = vector.broadcast %cst_43 : f32 to vector<8x8xf32>
    %51 = arith.mulf %49, %50 : vector<8x8xf32>
    %c0_44 = arith.constant 0 : index
    %c3 = arith.constant 3 : index
    %c0_45 = arith.constant 0 : index
    %c0_46 = arith.constant 0 : index
    %52 = vector.load %arg5[%c0_44, %c3, %c0_45, %c0_46] : memref<1x4x8x8xf32, #tpu.memory_space<vmem>>, vector<1x1x8x8xf32>
    %53 = vector.shape_cast %52 : vector<1x1x8x8xf32> to vector<8x8xf32>
    %54 = vector.shape_cast %51 : vector<8x8xf32> to vector<1x1x8x8xf32>
    tpu.vector_store %arg5[%c0_44, %c3, %c0_45, %c0_46], %54 {strides = array<i32>} : memref<1x4x8x8xf32, #tpu.memory_space<vmem>>, vector<1x1x8x8xf32>,
    %55 = vector.extract_strided_slice %6 {offsets = [0, 56], sizes = [8, 8], strides = [1, 1]} : vector<8x96xf32> to vector<8x8xf32>
    %c0_47 = arith.constant 0 : index
    %c3_48 = arith.constant 3 : index
    %c0_49 = arith.constant 0 : index
    %c0_50 = arith.constant 0 : index
    %56 = vector.load %arg6[%c0_47, %c3_48, %c0_49, %c0_50] : memref<1x4x8x8xf32, #tpu.memory_space<vmem>>, vector<1x1x8x8xf32>
    %57 = vector.shape_cast %56 : vector<1x1x8x8xf32> to vector<8x8xf32>
    %58 = vector.shape_cast %55 : vector<8x8xf32> to vector<1x1x8x8xf32>
    tpu.vector_store %arg6[%c0_47, %c3_48, %c0_49, %c0_50], %58 {strides = array<i32>} : memref<1x4x8x8xf32, #tpu.memory_space<vmem>>, vector<1x1x8x8xf32>,
    %59 = vector.extract_strided_slice %6 {offsets = [0, 88], sizes = [8, 8], strides = [1, 1]} : vector<8x96xf32> to vector<8x8xf32>
    %c0_51 = arith.constant 0 : index
    %c3_52 = arith.constant 3 : index
    %c0_53 = arith.constant 0 : index
    %c0_54 = arith.constant 0 : index
    %60 = vector.load %arg7[%c0_51, %c3_52, %c0_53, %c0_54] : memref<1x4x8x8xf32, #tpu.memory_space<vmem>>, vector<1x1x8x8xf32>
    %61 = vector.shape_cast %60 : vector<1x1x8x8xf32> to vector<8x8xf32>
    %62 = vector.shape_cast %59 : vector<8x8xf32> to vector<1x1x8x8xf32>
    tpu.vector_store %arg7[%c0_51, %c3_52, %c0_53, %c0_54], %62 {strides = array<i32>} : memref<1x4x8x8xf32, #tpu.memory_space<vmem>>, vector<1x1x8x8xf32>,
    return
  }
  func.func @transform_0(%arg0: i32, %arg1: i32) -> (i32, i32, i32) {
    %c0_i32 = arith.constant 0 : i32
    %c0_i32_0 = arith.constant 0 : i32
    return %arg0, %arg1, %c0_i32 : i32, i32, i32
  }
  func.func @transform_1(%arg0: i32, %arg1: i32) -> (i32, i32) {
    %c0_i32 = arith.constant 0 : i32
    %c0_i32_0 = arith.constant 0 : i32
    %c0_i32_1 = arith.constant 0 : i32
    return %c0_i32, %c0_i32_0 : i32, i32
  }
  func.func @transform_2(%arg0: i32, %arg1: i32) -> (i32, i32) {
    %c0_i32 = arith.constant 0 : i32
    %c0_i32_0 = arith.constant 0 : i32
    %c0_i32_1 = arith.constant 0 : i32
    return %c0_i32, %c0_i32_0 : i32, i32
  }
  func.func @transform_3(%arg0: i32, %arg1: i32) -> (i32, i32, i32, i32) {
    %c0_i32 = arith.constant 0 : i32
    %c0_i32_0 = arith.constant 0 : i32
    %c0_i32_1 = arith.constant 0 : i32
    return %arg0, %c0_i32, %arg1, %c0_i32_0 : i32, i32, i32, i32
  }
  func.func @transform_4(%arg0: i32, %arg1: i32) -> (i32, i32, i32, i32) {
    %c0_i32 = arith.constant 0 : i32
    %c0_i32_0 = arith.constant 0 : i32
    %c0_i32_1 = arith.constant 0 : i32
    return %arg0, %c0_i32, %arg1, %c0_i32_0 : i32, i32, i32, i32
  }
  func.func @transform_5(%arg0: i32, %arg1: i32) -> (i32, i32, i32, i32) {
    %c0_i32 = arith.constant 0 : i32
    %c0_i32_0 = arith.constant 0 : i32
    %c0_i32_1 = arith.constant 0 : i32
    return %arg0, %c0_i32, %arg1, %c0_i32_0 : i32, i32, i32, i32
  }
}

</mosaic_0001>

<bundles_post_ra>
// kernel: tpu_custom_call.1
= control target key start
LH: loop header
LB: loop body
LE: loop exit
PB: predicated region body
PF: predicated region fallthrough
CT: control target
= control target key end

     0   :  { %11 = vsyncpa [#allocation3], 0  ;;  %s1404_s0 = inlined_call_operand.hbm [shape: f32[2,8,32], index: 0, kind: input, shape index: {}]   ;;  %s1405_s1 = inlined_call_operand.hbm [shape: f32[32,96], index: 1, kind: input, shape index: {}]   ;;  %s1406_s2 = inlined_call_operand.vmem [shape: f32[1,96], index: 2, kind: input, shape index: {}]   ;;  %s1407_s3 = inlined_call_operand.hbm [shape: f32[2,4,8,8], index: 3, kind: output, shape index: {0}]   ;;  %s1408_s4 = inlined_call_operand.hbm [shape: f32[2,4,8,8], index: 4, kind: output, shape index: {1}]   ;;  %s1409_s5 = inlined_call_operand.hbm [shape: f32[2,4,8,8], index: 5, kind: output, shape index: {2}]  }
   0x1   :  { %13 = vsyncpa [#allocation3 + $0x1], 0 }
   0x2   :  { %14 = vsyncpa [#allocation6], 0 }
   0x3   :  { %15 = vsyncpa [#allocation4], 0 }
   0x4   :  { %17 = vsyncpa [#allocation4 + $0x1], 0 }
   0x5   :  { %18 = vsyncpa [#allocation9], 0 }
   0x6   :  { %20 = vsyncpa [#allocation9 + $0x1], 0  ;;  %s1076_s18 = smov 0   ;;  %s1078_s19 = smov 0  }
   0x7   :  { %s1080_s20 = smov 0   ;;  %s1082_s21 = smov 0  }
   0x8   :  { %s1084_s22 = smov 0   ;;  %s1086_s23 = smov 0  }
   0x9 LB: > { %s1107_s24 = sadd.s32 4294967295, %s1021_s23   ;;  %s1413_s25 = sadd.s32 4294967294, %s1021_s23   ;;  %s1021_s23 = sphi %s1086_s23, %s26_s23   ;;  %s1017_s22 = sphi %s1084_s22, %s1435_s22   ;;  %s1013_s21 = sphi %s1082_s21, %s1434_s21   ;;  %s1009_s20 = sphi %s1080_s20, %s1433_s20   ;;  %s1005_s19 = sphi %s1078_s19, %s1432_s19   ;;  %s1001_s18 = sphi %s1076_s18, %s1431_s18  }
   0xa   : > { %p60_p0 = scmp.ne.s32.totalorder %s1005_s19, %s1001_s18  ;;  %p1410_p1 = scmp.eq.s32.totalorder %s1107_s24, 0 }
   0xb   : > { %p134_p3 = scmp.eq.s32.totalorder %s1413_s25, 1  ;;  %p658_p5 = scmp.ge.s32.totalorder %s1021_s23, 1 }
   0xc   : > { %p1118_p4 = por %p1410_p1, %p60_p0  ;;  %p197_p7 = scmp.lt.s32.totalorder %s1021_s23, 3 }
   0xd   : > { %p1123_p6 = por %p134_p3, %p60_p0  ;;  %s1023_s29 = smov [#allocation5]  }
   0xe   : > { %s1414_s26 = scalar_select %p1118_p4, 1, 0 }
   0xf   : > { %s1415_s27 = scalar_select %p1123_p6, 1, 0 }
  0x10   : > { %p1128_p8 = pnand %p658_p5, %p197_p7  ;;  %s209_s30 = sshll.u32 %s1023_s29, 4  ;;  %s210_s30 = int_to_ptr.vmem [resolvable:$true] %s209_s30 }
  0x11   : > { %s38_s7 = sadd.s32 1, %s1017_s22  ;;  %s817_s10 = scalar_lea.hbm %s1405_s1, 512 }
  0x12   : > { %s1416_s28 = scalar_select %p1128_p8, 1, 0 }
  0x13   : > { %p728_p9 = pneg %p1128_p8  ;;  %p818_p12 = scmp.ne.s32.totalorder %s1405_s1, %s817_s10 }
  0x14   : > { %p824_p5 = scmp.lt.u32.totalorder %s817_s10, %s1405_s1 }
  0x15   : > { %p1137_p11 = pnand %p728_p9, %p1410_p1 }
  0x17   : > { %p819_p13 = pneg %p1137_p11 }
  0x19   : > { %p820_p0 = pnand %p819_p13, %p818_p12 }
  0x1b   : > { %p821_p3 = pneg %p820_p0 }
  0x1d   : > { %p826_p7 = pnand %p824_p5, %p821_p3 }
  0x1f   : > { %829 = shalt.err (!%p826_p7)
}
  0x20   : > { %s830_s15 = scalar_lea.vmem %s210_s30, 512  ;;  %p838_p2 = scmp.lt.s32.totalorder %s210_s30, %s210_s30 }
  0x21   : > { %p831_p9 = scmp.ne.s32.totalorder %s210_s30, %s830_s15  ;;  %p839_p6 = scmp.lt.s32.totalorder %s830_s15, %s830_s15 }
  0x23   : > { %p833_p10 = pnand %p831_p9, %p819_p13  ;;  %p840_p4 = por %p839_p6, %p838_p2 }
  0x25   : > { %p834_p1 = pneg %p833_p10 }
  0x27   : > { %p841_p8 = pnand %p840_p4, %p834_p1 }
  0x29   : > { %844 = shalt.err (!%p841_p8)
}
  0x2a   : > { %s1024_s16 = smov 128   ;;  %s1025_s17 = smov 8  }
  0x2b   : > { %731 = dma.hbm_to_vmem [thread:$0]  (!%p1137_p11), %s1405_s1, 512, %s210_s30, [#allocation6], %s1024_s16, %s1024_s16, %s1025_s17  }
  0x2c   : > { %p40_p1 = scmp.ge.s32.totalorder %s38_s7, 2  ;;  %s47_s9 = sadd.s32 1, %s1009_s20 }
  0x2d   : > { %p54_p2 = scmp.ne.s32.totalorder %s1009_s20, %s1005_s19  ;;  %p55_p4 = scmp.eq.s32.totalorder %s1021_s23, 0 }
  0x2e   : > { %s1437_s7 = smov (%p40_p1, %s38_s7), 0  ;;  %p1419_p8 = scmp.eq.s32.totalorder %s1107_s24, 1 }
  0x2f   : > { %p1164_p6 = por %p55_p4, %p54_p2  ;;  %s42_s6 = ssub.s32 %s1017_s22, %s1437_s7 }
  0x30   : > { %p1170_p10 = por %p1419_p8, %p54_p2  ;;  %p747_p12 = scmp.lt.s32.totalorder %s1021_s23, 2 }
  0x31   : > { %p45_p11 = scmp.eq.s32.totalorder %s42_s6, 0  ;;  %s226_s30 = sand.u32 1, %s1009_s20  }
  0x32   : > { %s661_s12 = sshll.u32 %s226_s30, 3  ;;  %s662_s14 = sshll.u32 %s1017_s22, 7 }
  0x33   : > { %s1179_s13 = scalar_select %p45_p11, %s1009_s20, %s47_s9  }
  0x34   : > { %s1185_s17 = scalar_lea.hbm %s1404_s0, %s662_s14  ;;  %s230_s29 = scalar_lea.vmem [#allocation2], %s661_s12 }
  0x35   : > { %s238_s8 = sshll.u32 %s230_s29, 4  ;;  %p1191_p13 = pnand %p747_p12, %p1164_p6  ;;  %s1187_s8 = int_to_ptr.vmem [resolvable:$true] %s238_s8 }
  0x36   : > { %s227_s9 = scalar_lea.sflag [#allocation3], %s226_s30  ;;  %s845_s25 = scalar_lea.hbm %s1185_s17, 128 }
  0x37   : > { %p846_p0 = scmp.ne.s32.totalorder %s1185_s17, %s845_s25  ;;  %p847_p3 = pneg %p1191_p13 }
  0x38   : > { %s850_s15 = scalar_lea.hbm %s1404_s0, 256  ;;  %p851_p9 = scmp.lt.u32.totalorder %s1185_s17, %s1404_s0 }
  0x39   : > { %p848_p5 = pnand %p847_p3, %p846_p0  ;;  %p852_p1 = scmp.lt.u32.totalorder %s850_s15, %s845_s25 }
  0x3a   : > { %p854_p4 = scmp.lt.u32.totalorder %s845_s25, %s1185_s17 }
  0x3b   : > { %p849_p7 = pneg %p848_p5  ;;  %p853_p2 = por %p852_p1, %p851_p9 }
  0x3d   : > { %p855_p6 = por %p854_p4, %p853_p2 }
  0x3f   : > { %p856_p8 = pnand %p855_p6, %p849_p7 }
  0x41   : > { %859 = shalt.err (!%p856_p8)
}
  0x42   : > { %s860_s30 = scalar_lea.vmem %s1187_s8, 128  ;;  %s1026_s29 = smov [#allocation2]  }
  0x43   : > { %p861_p12 = scmp.ne.s32.totalorder %s1187_s8, %s860_s30  ;;  %s865_s12 = sshll.u32 %s1026_s29, 4  ;;  %s866_s12 = int_to_ptr.vmem [resolvable:$false] %s865_s12 }
  0x44   : > { %s867_s14 = scalar_lea.vmem %s866_s12, 256  ;;  %p868_p5 = scmp.lt.s32.totalorder %s1187_s8, %s866_s12 }
  0x45   : > { %p863_p11 = pnand %p861_p12, %p847_p3  ;;  %p869_p9 = scmp.lt.s32.totalorder %s867_s14, %s860_s30 }
  0x47   : > { %p864_p0 = pneg %p863_p11  ;;  %p870_p1 = por %p869_p9, %p868_p5 }
  0x49   : > { %p871_p2 = pnand %p870_p1, %p864_p0 }
  0x4b   : > { %874 = shalt.err (!%p871_p2)
}
  0x4c   : > { %735 = dma.hbm_to_vmem [thread:$0]  (!%p1191_p13), %s1185_s17, 128, %s1187_s8, %s227_s9  }
  0x4d   : > { %p1422_p7 = scmp.ne.s32.totalorder %s1416_s28, 0 }
  0x4e   : > { %s1223_s25 = sand.u32 (!%p1422_p7), 1, %s1005_s19   ;;  %p1423_p3 = scmp.ne.s32.totalorder (!%p1422_p7), %s1414_s26, 0 }
  0x4f   : > { %247 = sbr.rel (%p1422_p7) target bundleno = 496 (0x1f0), region = 32  ;;  %s664_s15 = sshll.u32 (!%p1422_p7), %s1223_s25, 3 }
  0x50   : > { %s250_s10 = scalar_lea.sflag (!%p1422_p7), [#allocation3], %s1223_s25  ;;  %s253_s16 = scalar_lea.vmem (!%p1422_p7), [#allocation2], %s664_s15 }
  0x56   : > { %984 = dma.done.wait (%p1423_p3), %s250_s10, 128  }
  0x57   : > { %986 = vsyncadd (%p1423_p3), %s250_s10, 4294967168  ;;  %p1424_p4 = scmp.eq.s32.totalorder %s1107_s24, 0 }
  0x59   : > { %988 = dma.done.wait (%p1424_p4), [#allocation6], 512   ;;  %p1425_p13 = pmov %p1424_p4 }
  0x5a   : > { %v1027_v0 = vmov 0.0|0.0   ;;  %vm1028_vm0 = vmmov 0   ;;  %v1029_v1 = vmov 0.0   ;;  %v295_v2 = vld [vmem:[#allocation5] sm:$0xff]  ;;  %v296_v3 = vld [vmem:[#allocation5 + $0x8] sm:$0xff]  ;;  %v297_v4 = vld [vmem:[#allocation5 + $0x10] sm:$0xff] }
  0x5b   : > { %990 = vsyncadd (%p1425_p13), [#allocation6], 4294966784  ;;  %710 = vmatprep.subr.bf16.mxu0 %v1027_v0  ;;  %707 = vmatprep.mubr.msk.f32.mxu0 %vm1028_vm0, %v1029_v1  ;;  %v711_v5 = vpack.c.bf16 %v296_v3, %v295_v2  ;;  %v298_v6 = vld [vmem:[#allocation5 + $0x18] sm:$0xff]  ;;  %vm306_vm1 = vcmask 261120   ;;  %v669_v9 = vld [vmem:[%s1406_s2] ss:$0 sm:$0xff] }
  0x5c   : > { %v714_v7 = vpack.c.bf16 %v298_v6, %v297_v4  ;;  %v294_v8 = vld [vmem:[%s253_s16] sm:$0xff]  ;;  %s1239_s17 = sshll.u32 %s1223_s25, 5  ;;  %vm381_vm2 = vcmask 64512   ;;  %s1030_s8 = smov 80  }
  0x5d   : > { %712 = vmatpush3.bf16.msra.mxu0 %v711_v5  ;;  %s1031_s6 = smov 96   ;;  %s1242_s9 = scalar_lea.vmem [#allocation7], %s1239_s17 }
  0x5e   : > { %713 = vmatprep.subr.bf16.mxu0 %v1027_v0  ;;  %s1032_s30 = smov 72   ;;  %s1033_s29 = smov 88  }
  0x5f   : > { %s1034_s12 = smov 64   ;;  %s1035_s14 = smov 120  }
  0x60   : > { %s1036_s15 = smov 56   ;;  %s1037_s10 = smov 112  }
  0x61   : > { %715 = vmatpush3.bf16.msra.mxu0 %v714_v7  ;;  %s1038_s16 = smov 48   ;;  %s1039_s26 = smov 104  }
  0x62   : > { %s1040_s28 = smov 40  }
  0x64   : > { %708 = vmatmul.mubr.msk.f32.vlgmr.msra.gmra.mrb[0].mxu0 %vm306_vm1, %v294_v8 }
 0x137   : > { %v376_v10 = vpop.f32.mrb[0].mxu0 }
 0x138   : > { %v377_v11 = vadd.f32 %v669_v9, %v376_v10  ;;  %v709_v12 = vpop.f32.mrb[1].mxu0 }
 0x13a   : > { %413 = vrot.lane.b32.xlu1 %v377_v11, %s1030_s8  ;;  %384 = vrot.lane.b32.xlu0 %v377_v11, %s1031_s6  ;;  %v380_v13 = vmul.f32 0.35355338, %v377_v11  ;;  %s286_s8 = scalar_lea.vmem [#allocation8], %s1239_s17 }
 0x13b   : > { %s480_s6 = sshll.u32 %s286_s8, 4  ;;  %s1251_s6 = int_to_ptr.vmem [resolvable:$true] %s480_s6 }
 0x13c   : > { %382 = vst.msk [vmem:[%s1242_s9] sm:$0xff] %vm381_vm2, %v380_v13 }
 0x13e   : > { %428 = vrot.lane.b32.xlu1 %v377_v11, %s1032_s30  ;;  %398 = vrot.lane.b32.xlu0 %v377_v11, %s1033_s29  ;;  %s443_s30 = sand.u32 1, %s1107_s24   ;;  %s1249_s29 = sshll.u32 %s1013_s21, 9 }
 0x13f   : > { %s1263_s21 = scalar_lea.sflag [#allocation9], %s443_s30  ;;  %s875_s24 = scalar_lea.vmem %s1251_s6, 512 }
 0x140   : > { %p876_p6 = scmp.ne.s32.totalorder %s1251_s6, %s875_s24 }
 0x142   : > { %388 = vrot.lane.b32.xlu0 %v377_v11, %s1034_s12  ;;  %393 = vrot.lane.b32.xlu1 %v380_v13, %s1035_s14  ;;  %p877_p8 = pnand %p876_p6, %p1170_p10 }
 0x144   : > { %p878_p12 = pneg %p877_p8 }
 0x146   : > { %403 = vrot.lane.b32.xlu0 %v377_v11, %s1036_s15  ;;  %408 = vrot.lane.b32.xlu1 %v380_v13, %s1037_s10  ;;  %s1259_s15 = scalar_lea.hbm %s1408_s4, %s1249_s29  ;;  %s1041_s10 = smov [#allocation8]  }
 0x14a   : > { %418 = vrot.lane.b32.xlu0 %v377_v11, %s1038_s16  ;;  %423 = vrot.lane.b32.xlu1 %v380_v13, %s1039_s26  ;;  %s879_s16 = sshll.u32 %s1041_s10, 4  ;;  %s880_s16 = int_to_ptr.vmem [resolvable:$false] %s879_s16 }
 0x14b   : > { %s881_s26 = scalar_lea.vmem %s880_s16, 1024  ;;  %p882_p11 = scmp.lt.s32.totalorder %s1251_s6, %s880_s16 }
 0x14c   : > { %p883_p0 = scmp.lt.s32.totalorder %s881_s26, %s875_s24 }
 0x14e   : > { %433 = vrot.lane.b32.xlu0 %v377_v11, %s1040_s28  ;;  %p884_p5 = por %p883_p0, %p882_p11 }
 0x150   : > { %p885_p9 = pnand %p884_p5, %p878_p12 }
 0x1ac   : > { %v414_v14 = vpop.permute.xlu1 %413  ;;  %v385_v15 = vpop.permute.xlu0 %384 }
 0x1ad   : > { %675 = vst.msk [vmem:[%s286_s8 + $0x10] sm:$0xff] %vm381_vm2, %v414_v14  ;;  %387 = vst.msk [vmem:[%s286_s8] sm:$0xff] %vm381_vm2, %v385_v15 }
 0x1b0   : > { %v429_v16 = vpop.permute.xlu1 %428  ;;  %v399_v17 = vpop.permute.xlu0 %398 }
 0x1b1   : > { %678 = vst.msk [vmem:[%s286_s8 + $0x18] sm:$0xff] %vm381_vm2, %v429_v16  ;;  %672 = vst.msk [vmem:[%s286_s8 + $0x8] sm:$0xff] %vm381_vm2, %v399_v17 }
 0x1b2   : > { %888 = shalt.err (!%p885_p9)
}
 0x1b3   : > { %s889_s28 = scalar_lea.hbm %s1259_s15, 512  ;;  %s893_s12 = scalar_lea.hbm %s1408_s4, 1024 }
 0x1b4   : > { %p890_p1 = scmp.ne.s32.totalorder %s1259_s15, %s889_s28  ;;  %p894_p3 = scmp.lt.u32.totalorder %s1259_s15, %s1408_s4 }
 0x1b5   : > { %p895_p4 = scmp.lt.u32.totalorder %s893_s12, %s889_s28  ;;  %p897_p6 = scmp.lt.u32.totalorder %s889_s28, %s1259_s15 }
 0x1b6   : > { %p891_p2 = pnand %p890_p1, %p1170_p10 }
 0x1b7   : > { %p896_p13 = por %p895_p4, %p894_p3 }
 0x1b8   : > { %p892_p7 = pneg %p891_p2 }
 0x1b9   : > { %p898_p8 = por %p897_p6, %p896_p13 }
 0x1bb   : > { %p899_p12 = pnand %p898_p8, %p892_p7 }
 0x1bd   : > { %902 = shalt.err (!%p899_p12)
}
 0x1be   : > { %s1042_s24 = smov 128   ;;  %s1043_s16 = smov 8   ;;  %v389_v18 = vpop.permute.xlu0 %388  ;;  %v394_v19 = vpop.permute.xlu1 %393 }
 0x1bf   : > { %723 = dma.vmem_to_hbm [thread:$0]  (%p1170_p10), %s1251_s6, 512, %s1259_s15, %s1263_s21, %s1042_s24, %s1042_s24, %s1043_s16  }
 0x1c0   : > { %s1291_s26 = scalar_lea.vmem [#allocation10], %s1239_s17  ;;  %671 = vst.msk [vmem:[%s1242_s9 + $0x8] sm:$0xff] %vm381_vm2, %v394_v19  ;;  %s463_s28 = sshll.u32 %s1242_s9, 4  ;;  %s1302_s28 = int_to_ptr.vmem [resolvable:$true] %s463_s28 }
 0x1c1   : > { %391 = vst.msk [vmem:[%s1291_s26] sm:$0xff] %vm381_vm2, %v389_v18  ;;  %s1308_s15 = scalar_lea.hbm %s1407_s3, %s1249_s29  ;;  %s903_s12 = scalar_lea.vmem %s1302_s28, 512 }
 0x1c2   : > { %v404_v20 = vpop.permute.xlu0 %403  ;;  %v409_v21 = vpop.permute.xlu1 %408  ;;  %p904_p11 = scmp.ne.s32.totalorder %s1302_s28, %s903_s12  ;;  %s1044_s14 = smov [#allocation7]  }
 0x1c3   : > { %673 = vst.msk [vmem:[%s1291_s26 + $0x8] sm:$0xff] %vm381_vm2, %v404_v20  ;;  %674 = vst.msk [vmem:[%s1242_s9 + $0x10] sm:$0xff] %vm381_vm2, %v409_v21  ;;  %s907_s10 = sshll.u32 %s1044_s14, 4  ;;  %s908_s10 = int_to_ptr.vmem [resolvable:$false] %s907_s10 }
 0x1c4   : > { %p905_p0 = pnand %p904_p11, %p1170_p10  ;;  %s909_s17 = scalar_lea.vmem %s908_s10, 1024 }
 0x1c5   : > { %p910_p9 = scmp.lt.s32.totalorder %s1302_s28, %s908_s10  ;;  %p911_p1 = scmp.lt.s32.totalorder %s909_s17, %s903_s12 }
 0x1c6   : > { %v419_v22 = vpop.permute.xlu0 %418  ;;  %v424_v23 = vpop.permute.xlu1 %423  ;;  %p906_p5 = pneg %p905_p0 }
 0x1c7   : > { %676 = vst.msk [vmem:[%s1291_s26 + $0x10] sm:$0xff] %vm381_vm2, %v419_v22  ;;  %677 = vst.msk [vmem:[%s1242_s9 + $0x18] sm:$0xff] %vm381_vm2, %v424_v23  ;;  %p912_p2 = por %p911_p1, %p910_p9 }
 0x1c9   : > { %p913_p7 = pnand %p912_p2, %p906_p5 }
 0x1cb   : > { %916 = shalt.err (!%p913_p7)
}
 0x1cc   : > { %s917_s9 = scalar_lea.hbm %s1308_s15, 512  ;;  %s921_s14 = scalar_lea.hbm %s1407_s3, 1024 }
 0x1cd   : > { %p918_p3 = scmp.ne.s32.totalorder %s1308_s15, %s917_s9  ;;  %p922_p6 = scmp.lt.u32.totalorder %s1308_s15, %s1407_s3 }
 0x1ce   : > { %p923_p8 = scmp.lt.u32.totalorder %s921_s14, %s917_s9  ;;  %p925_p11 = scmp.lt.u32.totalorder %s917_s9, %s1308_s15 }
 0x1cf   : > { %p919_p4 = pnand %p918_p3, %p1170_p10 }
 0x1d0   : > { %p924_p12 = por %p923_p8, %p922_p6 }
 0x1d1   : > { %p920_p13 = pneg %p919_p4 }
 0x1d2   : > { %p926_p0 = por %p925_p11, %p924_p12 }
 0x1d4   : > { %p927_p5 = pnand %p926_p0, %p920_p13 }
 0x1d6   : > { %930 = shalt.err (!%p927_p5)
}
 0x1d7   : > { %s1426_s12 = scalar_lea.sflag [#allocation4], %s1223_s25  ;;  %s1427_s8 = sshll.u32 %s1291_s26, 4  ;;  %v434_v24 = vpop.permute.xlu0 %433  ;;  %s1344_s8 = int_to_ptr.vmem [resolvable:$true] %s1427_s8 }
 0x1d8   : > { %722 = dma.vmem_to_hbm [thread:$0]  (%p1170_p10), %s1302_s28, 512, %s1308_s15, %s1426_s12, %s1042_s24, %s1042_s24, %s1043_s16  }
 0x1d9   : > { %s1350_s9 = scalar_lea.hbm %s1409_s5, %s1249_s29  ;;  %679 = vst.msk [vmem:[%s1291_s26 + $0x18] sm:$0xff] %vm381_vm2, %v434_v24  ;;  %s931_s25 = scalar_lea.vmem %s1344_s8, 512 }
 0x1da   : > { %p932_p9 = scmp.ne.s32.totalorder %s1344_s8, %s931_s25  ;;  %s1045_s28 = smov [#allocation10]  }
 0x1db   : > { %s935_s15 = sshll.u32 %s1045_s28, 4  ;;  %s936_s15 = int_to_ptr.vmem [resolvable:$false] %s935_s15 }
 0x1dc   : > { %p933_p1 = pnand %p932_p9, %p1170_p10  ;;  %s937_s6 = scalar_lea.vmem %s936_s15, 1024 }
 0x1dd   : > { %p938_p7 = scmp.lt.s32.totalorder %s1344_s8, %s936_s15  ;;  %p939_p3 = scmp.lt.s32.totalorder %s937_s6, %s931_s25 }
 0x1de   : > { %p934_p2 = pneg %p933_p1 }
 0x1df   : > { %p940_p4 = por %p939_p3, %p938_p7 }
 0x1e1   : > { %p941_p13 = pnand %p940_p4, %p934_p2 }
 0x1e3   : > { %944 = shalt.err (!%p941_p13)
}
 0x1e4   : > { %s945_s29 = scalar_lea.hbm %s1350_s9, 512  ;;  %s949_s10 = scalar_lea.hbm %s1409_s5, 1024 }
 0x1e5   : > { %p946_p6 = scmp.ne.s32.totalorder %s1350_s9, %s945_s29  ;;  %p950_p11 = scmp.lt.u32.totalorder %s1350_s9, %s1409_s5 }
 0x1e6   : > { %p951_p0 = scmp.lt.u32.totalorder %s949_s10, %s945_s29  ;;  %p953_p9 = scmp.lt.u32.totalorder %s945_s29, %s1350_s9 }
 0x1e7   : > { %p947_p8 = pnand %p946_p6, %p1170_p10 }
 0x1e8   : > { %p952_p5 = por %p951_p0, %p950_p11 }
 0x1e9   : > { %p948_p12 = pneg %p947_p8 }
 0x1ea   : > { %p954_p1 = por %p953_p9, %p952_p5 }
 0x1ec   : > { %p955_p2 = pnand %p954_p1, %p948_p12 }
 0x1ee   : > { %958 = shalt.err (!%p955_p2)
}
 0x1ef   : > { %724 = dma.vmem_to_hbm [thread:$0]  (%p1170_p10), %s1344_s8, 512, %s1350_s9, %s1263_s21, %s1042_s24, %s1042_s24, %s1043_s16  }
 0x1f0 PF: > { %s512_s17 = sand.u32 1, %s1001_s18   ;;  %p1428_p7 = scmp.ne.s32.totalorder %s1415_s27, 0 }
 0x1f1   : > { %p1429_p3 = scmp.ge.s32.totalorder %s1021_s23, 2  ;;  %s513_s25 = scalar_lea.sflag [#allocation4], %s512_s17 }
 0x1f3   : > { %p737_p4 = pnand %p1429_p3, %p1428_p7 }
 0x1f5   : > { %992 = dma.done.wait (!%p737_p4), %s513_s25, 512  }
 0x1f6   : > { %994 = vsyncadd (!%p737_p4), %s513_s25, 4294966784  ;;  %s1430_s11 = sadd.s32 4294967294, %s1021_s23  }
 0x1f7   : > { %s521_s28 = sand.u32 1, %s1430_s11  }
 0x1f8   : > { %s522_s15 = scalar_lea.sflag [#allocation9], %s521_s28 }
 0x1f9   : > { %996 = dma.done.wait (!%p737_p4), %s522_s15, 1024  }
 0x1fa   : > { %998 = vsyncadd (!%p737_p4), %s522_s15, 4294966272  ;;  %s26_s23 = sadd.s32 1, %s1021_s23   ;;  %s1431_s18 = smov %s1005_s19 }
 0x1fb   : > { %p23_p10 = scmp.ge.s32.totalorder %s26_s23, 4   ;;  %s1432_s19 = smov %s1009_s20 }
 0x1fc   : > { %s1433_s20 = smov %s1179_s13  ;;  %s1434_s21 = smov %s1017_s22 }
 0x1fd   : > { %s1435_s22 = smov %s1437_s7  ;;  %25 = sbr.rel (!%p23_p10) target bundleno = 9 (0x9), region = 122 }
 0x204   :  { %536 = vsyncpa [#allocation3], 1 }
 0x205   :  { %538 = vsyncpa [#allocation3 + $0x1], 1 }
 0x206   :  { %539 = vsyncpa [#allocation6], 1 }
 0x207   :  { %540 = vsyncpa [#allocation4], 1 }
 0x208   :  { %542 = vsyncpa [#allocation4 + $0x1], 1 }
 0x209   :  { %543 = vsyncpa [#allocation9], 1 }
 0x20a   :  { %545 = vsyncpa [#allocation9 + $0x1], 1 }

</bundles_post_ra>
